<compile_context>
chip_gen: v7x
topology: tpu7x:2x2x1
jax: 0.10.0
libtpu: 0.0.40
codegen_flags: <defaults>
</compile_context>

<pallas_src>
import jax
import jax.numpy as jnp
import numpy as np
from jax.experimental import pallas as pl
from jax.experimental.pallas import tpu as pltpu


def attention_kernel(enc_ref, attdec_ref, we_ref, wf_ref, weighted_ref, alpha_ref):
    TB, N, E = enc_ref.shape
    A = we_ref.shape[1]

    enc = enc_ref[...]                                            # (TB, N, E)

    # Encoder projection: single MXU matmul with M = TB*N (N == 8 so the collapse of the
    # two leading dims is layout-free).
    att_enc = jnp.dot(enc.reshape(TB * N, E), we_ref[...],
                      preferred_element_type=jnp.float32)          # (TB*N, A)
    att_enc = att_enc.reshape(TB, N, A)                            # (TB, N, A)

    # attdec_ref already holds dec @ Wd^T + bd + be  (hoisted to the wrapper, exact).
    att = jnp.maximum(att_enc + attdec_ref[...], 0.0)              # (TB, N, A)  f32

    # full_att: width-1 "matmul" as VPU multiply + cross-lane reduce over A.
    # The full_att bias bf is softmax-invariant (softmax(s + c) == softmax(s)), so it is
    # folded out exactly — alpha and weighted_enc are unchanged.
    scores = jnp.sum(att * wf_ref[...], axis=-1)                   # (TB, N)  lane-major

    # Softmax over N (cross-lane reductions, lane-major layout, no transpose).
    m = jnp.max(scores, axis=-1, keepdims=True)                    # (TB, 1)
    e = jnp.exp(scores - m)                                        # (TB, N)
    denom = jnp.sum(e, axis=-1, keepdims=True)                     # (TB, 1)
    alpha = e * pl.reciprocal(denom, approx=True)                  # (TB, N)
    alpha_ref[...] = alpha.astype(alpha_ref.dtype)

    # Weighted encoder sum: VPU multiply + sublane reduce over N (no M=1 matmul).
    weighted = jnp.sum(enc * alpha[:, :, None], axis=1)            # (TB, E)  f32
    weighted_ref[...] = weighted.astype(weighted_ref.dtype)


def _choose_tb(B, N, E, itemsize, budget_bytes=8 << 20):
    """Largest legal per-step batch tile: divides B, sublane-aligned (or == B),
    double-buffered enc block fits the budget, and (when possible) leaves >= 2 grid
    steps so v7x's two TensorCores both get work."""
    def legal(tb):
        return B % tb == 0 and (tb % 8 == 0 or tb == B)

    def fits(tb):
        return 2 * tb * N * E * itemsize <= budget_bytes

    cands = [tb for tb in range(1, B + 1) if legal(tb) and fits(tb)]
    if not cands:
        return B  # tiny problems: whole batch in one step
    two_step = [tb for tb in cands if tb <= B // 2]
    return max(two_step) if two_step else max(cands)


def attention_pallas(enc_out, dec_out, params, *, compute_dtype=jnp.float32, tb=None):
    """enc_out: (B, N, E), dec_out: (B, D). Returns (weighted_enc (B, E), alpha (B, N)).

    compute_dtype=jnp.bfloat16 halves the dominant enc_out HBM stream on v6e/v7x; the
    softmax and all reductions stay in f32 (required on v5e, good for accuracy everywhere).
    """
    B, N, E = enc_out.shape
    A = params["we"].shape[0]  # torch Linear weight is (out, in)

    itemsize = jnp.dtype(compute_dtype).itemsize
    TB = tb if tb is not None else _choose_tb(B, N, E, itemsize)
    assert B % TB == 0
    grid = (B // TB,)

    # Hoisted decoder projection (+ both additive biases, exact): one fused XLA matmul.
    att_dec = dec_out @ params["wd"].T + params["bd"] + params["be"]       # (B, A)
    att_dec = att_dec.astype(jnp.float32)[:, None, :]                      # (B, 1, A)

    we_t = params["we"].T.astype(compute_dtype)                            # (E, A)
    wf_row = params["wf"].reshape(1, 1, A).astype(jnp.float32)             # (1, 1, A)
    enc_in = enc_out.astype(compute_dtype)

    out_shapes = (
        jax.ShapeDtypeStruct((B, E), jnp.float32),
        jax.ShapeDtypeStruct((B, N), jnp.float32),
    )

    return pl.pallas_call(
        attention_kernel,
        out_shape=out_shapes,
        grid_spec=pltpu.PrefetchScalarGridSpec(
            num_scalar_prefetch=0,
            grid=grid,
            in_specs=[
                pl.BlockSpec((TB, N, E), lambda b: (b, 0, 0)),   # enc_out tile
                pl.BlockSpec((TB, 1, A), lambda b: (b, 0, 0)),   # hoisted dec projection
                pl.BlockSpec((E, A), lambda b: (0, 0)),          # W_enc^T
                pl.BlockSpec((1, 1, A), lambda b: (0, 0, 0)),    # W_full row
            ],
            out_specs=[
                pl.BlockSpec((TB, E), lambda b: (b, 0)),         # weighted_enc
                pl.BlockSpec((TB, N), lambda b: (b, 0)),         # alpha (lane-major)
            ],
        ),
        compiler_params=pltpu.CompilerParams(
            dimension_semantics=("parallel",),
            # Above v5e's 16 MiB scoped default, comfortably below v7x's 64 MiB physical.
            vmem_limit_bytes=32 * 1024 * 1024,
        ),
    )(enc_in, att_dec, we_t, wf_row)


def attention_ref(enc_out, dec_out, params):
    """Pure-JAX reference mirroring the PyTorch forward."""
    att_enc = enc_out @ params["we"].T + params["be"]                 # (B, N, A)
    att_dec = dec_out @ params["wd"].T + params["bd"]                 # (B, A)
    att = jax.nn.relu(att_enc + att_dec[:, None, :])                  # (B, N, A)
    att = att @ params["wf"].T + params["bf"]                         # (B, N, 1)
    alpha = jax.nn.softmax(att[..., 0], axis=1)                       # (B, N)
    weighted = (enc_out * alpha[..., None]).sum(axis=1)               # (B, E)
    return weighted, alpha


if __name__ == "__main__":
    B, N = 16, 8           # batch, num encoded "pixels"  (TB picker -> 8 rows/step, 2 steps)
    E, D, A = 32, 16, 32   # encoder_dim, decoder_dim, attention_dim

    key = jax.random.PRNGKey(0)
    k = jax.random.split(key, 8)
    enc_out = jax.random.normal(k[0], (B, N, E), dtype=jnp.float32)
    dec_out = jax.random.normal(k[1], (B, D), dtype=jnp.float32)

    # Deterministic parameters (torch nn.Linear shapes: weight (out, in), bias (out,))
    params = {
        "we": jax.random.normal(k[2], (A, E), dtype=jnp.float32) * 0.1,
        "be": jax.random.normal(k[3], (A,), dtype=jnp.float32) * 0.1,
        "wd": jax.random.normal(k[4], (A, D), dtype=jnp.float32) * 0.1,
        "bd": jax.random.normal(k[5], (A,), dtype=jnp.float32) * 0.1,
        "wf": jax.random.normal(k[6], (1, A), dtype=jnp.float32) * 0.1,
        "bf": jax.random.normal(k[7], (1,), dtype=jnp.float32) * 0.1,
    }

    weighted, alpha = attention_pallas(enc_out, dec_out, params)
    jax.block_until_ready((weighted, alpha))

    w_ref, a_ref = attention_ref(enc_out, dec_out, params)
    # Tolerance covers the EUP approximate reciprocal (~2^-12 relative) in the softmax.
    assert np.allclose(np.asarray(weighted), np.asarray(w_ref), atol=2e-3, rtol=2e-3)
    assert np.allclose(np.asarray(alpha), np.asarray(a_ref), atol=2e-3, rtol=2e-3)

    print("KERNEL_OK")
</pallas_src>

<mosaic_0001>
module attributes {stable_mosaic.version = 11 : i64} {
  func.func @attention_kernel(%arg0: i32, %arg1: memref<8x8x32xf32, #tpu.memory_space<vmem>>, %arg2: memref<8x1x32xf32, #tpu.memory_space<vmem>>, %arg3: memref<32x32xf32, #tpu.memory_space<vmem>>, %arg4: memref<1x1x32xf32, #tpu.memory_space<vmem>>, %arg5: memref<8x32xf32, #tpu.memory_space<vmem>>, %arg6: memref<8x8xf32, #tpu.memory_space<vmem>>) attributes {dimension_semantics = [#tpu.dimension_semantics<parallel>], iteration_bounds = array<i64: 2>, scalar_prefetch = 0 : i64, scratch_operands = 0 : i64, tpu.core_type = #tpu.core_type<tc>, window_params = [{transform_indices = @transform_0, window_bounds = array<i64: 8, 8, 32>}, {transform_indices = @transform_1, window_bounds = array<i64: 8, 1, 32>}, {pipeline_mode = #tpu.pipeline_mode<synchronous>, transform_indices = @transform_2, window_bounds = array<i64: 32, 32>}, {pipeline_mode = #tpu.pipeline_mode<synchronous>, transform_indices = @transform_3, window_bounds = array<i64: 1, 1, 32>}, {transform_indices = @transform_4, window_bounds = array<i64: 8, 32>}, {transform_indices = @transform_5, window_bounds = array<i64: 8, 8>}]} {
    %c0 = arith.constant 0 : index
    %c0_0 = arith.constant 0 : index
    %c0_1 = arith.constant 0 : index
    %0 = vector.load %arg1[%c0, %c0_0, %c0_1] : memref<8x8x32xf32, #tpu.memory_space<vmem>>, vector<8x8x32xf32>
    %1 = vector.shape_cast %0 : vector<8x8x32xf32> to vector<64x32xf32>
    %c0_2 = arith.constant 0 : index
    %c0_3 = arith.constant 0 : index
    %2 = vector.load %arg3[%c0_2, %c0_3] : memref<32x32xf32, #tpu.memory_space<vmem>>, vector<32x32xf32>
    %cst = arith.constant dense<0.000000e+00> : vector<64x32xf32>
    %3 = tpu.matmul %1, %2, %cst {dimension_numbers = #tpu.dot_dimension_numbers<[1], [0], [0], [1], [0, 0, 1, 1], [], []>} : vector<64x32xf32>, vector<32x32xf32>, vector<64x32xf32> -> vector<64x32xf32>
    %4 = vector.shape_cast %3 : vector<64x32xf32> to vector<8x8x32xf32>
    %c0_4 = arith.constant 0 : index
    %c0_5 = arith.constant 0 : index
    %c0_6 = arith.constant 0 : index
    %5 = vector.load %arg2[%c0_4, %c0_5, %c0_6] : memref<8x1x32xf32, #tpu.memory_space<vmem>>, vector<8x1x32xf32>
    %6 = vector.broadcast %5 : vector<8x1x32xf32> to vector<8x8x32xf32>
    %7 = arith.addf %4, %6 : vector<8x8x32xf32>
    %cst_7 = arith.constant 0.000000e+00 : f32
    %8 = vector.broadcast %cst_7 : f32 to vector<8x8x32xf32>
    %9 = arith.maximumf %7, %8 : vector<8x8x32xf32>
    %c0_8 = arith.constant 0 : index
    %c0_9 = arith.constant 0 : index
    %c0_10 = arith.constant 0 : index
    %10 = vector.load %arg4[%c0_8, %c0_9, %c0_10] : memref<1x1x32xf32, #tpu.memory_space<vmem>>, vector<1x1x32xf32>
    %11 = vector.broadcast %10 : vector<1x1x32xf32> to vector<8x8x32xf32>
    %12 = arith.mulf %9, %11 : vector<8x8x32xf32>
    %cst_11 = arith.constant dense<0.000000e+00> : vector<8x8xf32>
    %13 = vector.multi_reduction <add>, %12, %cst_11 [2] : vector<8x8x32xf32> to vector<8x8xf32>
    %cst_12 = arith.constant dense<0xFF800000> : vector<8xf32>
    %14 = vector.multi_reduction <maximumf>, %13, %cst_12 [1] : vector<8x8xf32> to vector<8xf32>
    %15 = vector.shape_cast %14 : vector<8xf32> to vector<8x1xf32>
    %16 = vector.broadcast %15 : vector<8x1xf32> to vector<8x8xf32>
    %17 = arith.subf %13, %16 : vector<8x8xf32>
    %18 = math.exp %17 : vector<8x8xf32>
    %cst_13 = arith.constant dense<0.000000e+00> : vector<8xf32>
    %19 = vector.multi_reduction <add>, %18, %cst_13 [1] : vector<8x8xf32> to vector<8xf32>
    %20 = vector.shape_cast %19 : vector<8xf32> to vector<8x1xf32>
    %21 = tpu.reciprocal %20 {approx = true} : vector<8x1xf32> -> vector<8x1xf32>
    %22 = vector.broadcast %21 : vector<8x1xf32> to vector<8x8xf32>
    %23 = arith.mulf %18, %22 : vector<8x8xf32>
    %c0_14 = arith.constant 0 : index
    %c0_15 = arith.constant 0 : index
    %24 = vector.load %arg6[%c0_14, %c0_15] : memref<8x8xf32, #tpu.memory_space<vmem>>, vector<8x8xf32>
    tpu.vector_store %arg6[%c0_14, %c0_15], %23 {strides = array<i32>} : memref<8x8xf32, #tpu.memory_space<vmem>>, vector<8x8xf32>,
    %25 = vector.shape_cast %23 : vector<8x8xf32> to vector<8x8x1xf32>
    %26 = vector.broadcast %25 : vector<8x8x1xf32> to vector<8x8x32xf32>
    %27 = arith.mulf %0, %26 : vector<8x8x32xf32>
    %cst_16 = arith.constant dense<0.000000e+00> : vector<8x32xf32>
    %28 = vector.multi_reduction <add>, %27, %cst_16 [1] : vector<8x8x32xf32> to vector<8x32xf32>
    %c0_17 = arith.constant 0 : index
    %c0_18 = arith.constant 0 : index
    %29 = vector.load %arg5[%c0_17, %c0_18] : memref<8x32xf32, #tpu.memory_space<vmem>>, vector<8x32xf32>
    tpu.vector_store %arg5[%c0_17, %c0_18], %28 {strides = array<i32>} : memref<8x32xf32, #tpu.memory_space<vmem>>, vector<8x32xf32>,
    return
  }
  func.func @transform_0(%arg0: i32) -> (i32, i32, i32) {
    %c0_i32 = arith.constant 0 : i32
    %c0_i32_0 = arith.constant 0 : i32
    %c0_i32_1 = arith.constant 0 : i32
    return %arg0, %c0_i32, %c0_i32_0 : i32, i32, i32
  }
  func.func @transform_1(%arg0: i32) -> (i32, i32, i32) {
    %c0_i32 = arith.constant 0 : i32
    %c0_i32_0 = arith.constant 0 : i32
    %c0_i32_1 = arith.constant 0 : i32
    return %arg0, %c0_i32, %c0_i32_0 : i32, i32, i32
  }
  func.func @transform_2(%arg0: i32) -> (i32, i32) {
    %c0_i32 = arith.constant 0 : i32
    %c0_i32_0 = arith.constant 0 : i32
    %c0_i32_1 = arith.constant 0 : i32
    return %c0_i32, %c0_i32_0 : i32, i32
  }
  func.func @transform_3(%arg0: i32) -> (i32, i32, i32) {
    %c0_i32 = arith.constant 0 : i32
    %c0_i32_0 = arith.constant 0 : i32
    %c0_i32_1 = arith.constant 0 : i32
    %c0_i32_2 = arith.constant 0 : i32
    return %c0_i32, %c0_i32_0, %c0_i32_1 : i32, i32, i32
  }
  func.func @transform_4(%arg0: i32) -> (i32, i32) {
    %c0_i32 = arith.constant 0 : i32
    %c0_i32_0 = arith.constant 0 : i32
    return %arg0, %c0_i32 : i32, i32
  }
  func.func @transform_5(%arg0: i32) -> (i32, i32) {
    %c0_i32 = arith.constant 0 : i32
    %c0_i32_0 = arith.constant 0 : i32
    return %arg0, %c0_i32 : i32, i32
  }
}

</mosaic_0001>

<bundles_post_ra>
// kernel: tpu_custom_call.1
= control target key start
LH: loop header
LB: loop body
LE: loop exit
PB: predicated region body
PF: predicated region fallthrough
CT: control target
= control target key end

     0   :  { %s1940_s0 = inlined_call_operand.hbm [shape: f32[16,8,32], index: 0, kind: input, shape index: {}]   ;;  %s1941_s1 = inlined_call_operand.hbm [shape: f32[16,1,32], index: 1, kind: input, shape index: {}]   ;;  %s1942_s2 = inlined_call_operand.hbm [shape: f32[32,32], index: 2, kind: input, shape index: {}]   ;;  %s1943_s3 = inlined_call_operand.vmem [shape: f32[1,1,32], index: 3, kind: input, shape index: {}]   ;;  %s1944_s4 = inlined_call_operand.hbm [shape: f32[16,32], index: 4, kind: output, shape index: {0}]   ;;  %s1945_s5 = inlined_call_operand.vmem [shape: f32[16,8], index: 5, kind: output, shape index: {1}]  }
   0x1   :  { %1949 = sst [smem:[#allocation14_spill]] %s1940_s0 }
   0x2   :  { %1950 = sst [smem:[#allocation15_spill]] %s1942_s2 }
   0x3   :  { %11 = vsyncpa [#allocation3], 0 }
   0x4   :  { %13 = vsyncpa [#allocation3 + $0x1], 0 }
   0x5   :  { %14 = vsyncpa [#allocation6], 0 }
   0x6   :  { %16 = vsyncpa [#allocation6 + $0x1], 0 }
   0x7   :  { %17 = vsyncpa [#allocation4], 0 }
   0x8   :  { %19 = vsyncpa [#allocation4 + $0x1], 0  ;;  %s1496_s18 = smov 0   ;;  %s1498_s19 = smov 0  }
   0x9   :  { %s1500_s20 = smov 0   ;;  %s1502_s21 = smov 0  }
   0xa LB: > { %s1517_s22 = sadd.s32 4294967295, %s1455_s21   ;;  %s1123_s23 = sadd.s32 4294967294, %s1455_s21   ;;  %s1455_s21 = sphi %s1502_s21, %s1972_s21   ;;  %s1451_s20 = sphi %s1500_s20, %s1971_s20   ;;  %s1447_s19 = sphi %s1498_s19, %s1970_s19   ;;  %s1443_s18 = sphi %s1496_s18, %s1969_s18  }
   0xb   : > { %p45_p0 = scmp.ne.s32.totalorder %s1447_s19, %s1443_s18  ;;  %p1946_p1 = scmp.eq.s32.totalorder %s1517_s22, 0 }
   0xc   : > { %p143_p3 = scmp.eq.s32.totalorder %s1123_s23, 1  ;;  %p1124_p5 = scmp.ge.s32.totalorder %s1455_s21, 1 }
   0xd   : > { %p1526_p4 = por %p1946_p1, %p45_p0  ;;  %p176_p7 = scmp.lt.s32.totalorder %s1455_s21, 3 }
   0xe   : > { %p1531_p6 = por %p143_p3, %p45_p0  ;;  %s1457_s27 = smov [#allocation7]  }
   0xf   : > { %s1951_s24 = scalar_select %p1526_p4, 1, 0 }
  0x10   : > { %s1952_s25 = scalar_select %p1531_p6, 1, 0 }
  0x11   : > { %p1536_p8 = pnand %p1124_p5, %p176_p7  ;;  %s188_s28 = sshll.u32 %s1457_s27, 4  ;;  %s1540_s28 = int_to_ptr.vmem [resolvable:$true] %s188_s28 }
  0x12   : > { %s1552_s30 = sadd.s32 1, %s1455_s21   ;;  %s32_s6 = sadd.s32 1, %s1451_s20 }
  0x13   : > { %s1953_s26 = scalar_select %p1536_p8, 1, 0 }
  0x14   : > { %p1216_p9 = pneg %p1536_p8  ;;  %s29_s7 = ssub.s32 %s1455_s21, %s1552_s30 }
  0x15   : > { %s1955_s2 = sld [smem:[#allocation15_spill]] }
  0x16   : > { %p1547_p11 = pnand %p1216_p9, %p1946_p1 }
  0x18   : > { %p1295_p13 = pneg %p1547_p11 }
  0x1b   : > { %s1293_s10 = scalar_lea.hbm %s1955_s2, 512 }
  0x1c   : > { %p1294_p12 = scmp.ne.s32.totalorder %s1955_s2, %s1293_s10  ;;  %p1300_p5 = scmp.lt.u32.totalorder %s1293_s10, %s1955_s2 }
  0x1e   : > { %p1296_p0 = pnand %p1295_p13, %p1294_p12 }
  0x20   : > { %p1297_p3 = pneg %p1296_p0 }
  0x22   : > { %p1302_p7 = pnand %p1300_p5, %p1297_p3 }
  0x24   : > { %1305 = shalt.err (!%p1302_p7)
}
  0x25   : > { %s1306_s15 = scalar_lea.vmem %s1540_s28, 512  ;;  %p1314_p2 = scmp.lt.s32.totalorder %s1540_s28, %s1540_s28 }
  0x26   : > { %p1307_p9 = scmp.ne.s32.totalorder %s1540_s28, %s1306_s15  ;;  %p1315_p6 = scmp.lt.s32.totalorder %s1306_s15, %s1306_s15 }
  0x28   : > { %p1309_p10 = pnand %p1307_p9, %p1295_p13  ;;  %p1316_p4 = por %p1315_p6, %p1314_p2 }
  0x2a   : > { %p1310_p1 = pneg %p1309_p10 }
  0x2c   : > { %p1317_p8 = pnand %p1316_p4, %p1310_p1 }
  0x2e   : > { %1320 = shalt.err (!%p1317_p8)
}
  0x2f   : > { %s1458_s16 = smov 128   ;;  %s1459_s17 = smov 8  }
  0x30   : > { %1219 = dma.hbm_to_vmem [thread:$0]  (!%p1547_p11), %s1955_s2, 512, %s1540_s28, [#allocation6], %s1458_s16, %s1458_s16, %s1459_s17  }
  0x31   : > { %p30_p1 = scmp.eq.s32.totalorder %s29_s7, 0  ;;  %p39_p2 = scmp.ne.s32.totalorder %s1451_s20, %s1447_s19 }
  0x32   : > { %p40_p4 = scmp.eq.s32.totalorder %s1455_s21, 0  ;;  %p1232_p6 = scmp.lt.s32.totalorder %s1455_s21, 2 }
  0x33   : > { %s1586_s8 = scalar_select %p30_p1, %s1451_s20, %s32_s6  }
  0x34   : > { %p41_p8 = por %p40_p4, %p39_p2  ;;  %p1957_p10 = scmp.eq.s32.totalorder %s1517_s22, 1 }
  0x35   : > { %1956 = sst [smem:[#allocation13_spill]] %s1586_s8  ;;  %s1595_s29 = sand.u32 1, %s1451_s20  }
  0x36   : > { %p1590_p12 = por %p1957_p10, %p39_p2  ;;  %s1160_s10 = sshll.u32 %s1455_s21, 10 }
  0x37   : > { %s1127_s11 = sshll.u32 %s1595_s29, 6  ;;  %s1959_s0 = sld [smem:[#allocation14_spill]] }
  0x38   : > { %s209_s6 = scalar_lea.vmem [#allocation2], %s1127_s11  ;;  %p1604_p11 = pnand %p1232_p6, %p41_p8 }
  0x39   : > { %s216_s13 = sshll.u32 %s209_s6, 4  ;;  %s206_s23 = scalar_lea.sflag [#allocation3], %s1595_s29  ;;  %s1608_s13 = int_to_ptr.vmem [resolvable:$true] %s216_s13 }
  0x3a   : > { %p1323_p0 = pneg %p1604_p11 }
  0x3d   : > { %s1602_s7 = scalar_lea.hbm %s1959_s0, %s1160_s10  ;;  %s1326_s28 = scalar_lea.hbm %s1959_s0, 2048 }
  0x3e   : > { %s1321_s27 = scalar_lea.hbm %s1602_s7, 1024  ;;  %p1327_p7 = scmp.lt.u32.totalorder %s1602_s7, %s1959_s0 }
  0x3f   : > { %p1322_p13 = scmp.ne.s32.totalorder %s1602_s7, %s1321_s27  ;;  %p1328_p9 = scmp.lt.u32.totalorder %s1326_s28, %s1321_s27 }
  0x40   : > { %p1330_p2 = scmp.lt.u32.totalorder %s1321_s27, %s1602_s7 }
  0x41   : > { %p1324_p3 = pnand %p1323_p0, %p1322_p13  ;;  %p1329_p1 = por %p1328_p9, %p1327_p7 }
  0x43   : > { %p1325_p5 = pneg %p1324_p3  ;;  %p1331_p4 = por %p1330_p2, %p1329_p1 }
  0x45   : > { %p1332_p6 = pnand %p1331_p4, %p1325_p5 }
  0x47   : > { %1335 = shalt.err (!%p1332_p6)
}
  0x48   : > { %s1336_s15 = scalar_lea.vmem %s1608_s13, 1024  ;;  %s1460_s10 = smov [#allocation2]  }
  0x49   : > { %p1337_p8 = scmp.ne.s32.totalorder %s1608_s13, %s1336_s15  ;;  %s1341_s11 = sshll.u32 %s1460_s10, 4  ;;  %s1342_s11 = int_to_ptr.vmem [resolvable:$false] %s1341_s11 }
  0x4a   : > { %s1343_s12 = scalar_lea.vmem %s1342_s11, 2048  ;;  %p1344_p3 = scmp.lt.s32.totalorder %s1608_s13, %s1342_s11 }
  0x4b   : > { %p1339_p10 = pnand %p1337_p8, %p1323_p0  ;;  %p1345_p7 = scmp.lt.s32.totalorder %s1343_s12, %s1336_s15 }
  0x4d   : > { %p1340_p13 = pneg %p1339_p10  ;;  %p1346_p9 = por %p1345_p7, %p1344_p3 }
  0x4f   : > { %p1347_p1 = pnand %p1346_p9, %p1340_p13 }
  0x51   : > { %1350 = shalt.err (!%p1347_p1)
}
  0x52   : > { %1223 = dma.hbm_to_vmem [thread:$0]  (!%p1604_p11), %s1602_s7, 1024, %s1608_s13, %s206_s23, %s1458_s16, %s1458_s16, %s1459_s17  }
  0x53   : > { %s1130_s27 = sshll.u32 %s1595_s29, 3  ;;  %s1161_s28 = sshll.u32 %s1455_s21, 7 }
  0x54   : > { %s1647_s10 = scalar_lea.hbm %s1941_s1, %s1161_s28  ;;  %s230_s11 = scalar_lea.vmem [#allocation5], %s1130_s27 }
  0x55   : > { %s237_s12 = sshll.u32 %s230_s11, 4  ;;  %s1961_s0 = sand.u32 1, %s1455_s21   ;;  %s1649_s12 = int_to_ptr.vmem [resolvable:$true] %s237_s12 }
  0x56   : > { %s1653_s2 = scalar_lea.sflag [#allocation6], %s1961_s0  ;;  %s1351_s8 = scalar_lea.hbm %s1647_s10, 128 }
  0x57   : > { %p1352_p5 = scmp.ne.s32.totalorder %s1647_s10, %s1351_s8  ;;  %s1356_s29 = scalar_lea.hbm %s1941_s1, 256 }
  0x58   : > { %p1357_p6 = scmp.lt.u32.totalorder %s1647_s10, %s1941_s1  ;;  %p1358_p8 = scmp.lt.u32.totalorder %s1356_s29, %s1351_s8 }
  0x59   : > { %p1354_p2 = pnand %p1352_p5, %p1323_p0  ;;  %p1360_p13 = scmp.lt.u32.totalorder %s1351_s8, %s1647_s10 }
  0x5a   : > { %p1359_p10 = por %p1358_p8, %p1357_p6 }
  0x5b   : > { %p1355_p4 = pneg %p1354_p2 }
  0x5c   : > { %p1361_p3 = por %p1360_p13, %p1359_p10 }
  0x5e   : > { %p1362_p7 = pnand %p1361_p3, %p1355_p4 }
  0x60   : > { %1365 = shalt.err (!%p1362_p7)
}
  0x61   : > { %s1366_s0 = scalar_lea.vmem %s1649_s12, 128  ;;  %s1461_s23 = smov [#allocation5]  }
  0x62   : > { %p1367_p9 = scmp.ne.s32.totalorder %s1649_s12, %s1366_s0  ;;  %s1371_s27 = sshll.u32 %s1461_s23, 4  ;;  %s1372_s27 = int_to_ptr.vmem [resolvable:$false] %s1371_s27 }
  0x63   : > { %s1373_s28 = scalar_lea.vmem %s1372_s27, 256  ;;  %p1374_p2 = scmp.lt.s32.totalorder %s1649_s12, %s1372_s27 }
  0x64   : > { %p1369_p1 = pnand %p1367_p9, %p1323_p0  ;;  %p1375_p6 = scmp.lt.s32.totalorder %s1373_s28, %s1366_s0 }
  0x66   : > { %p1370_p5 = pneg %p1369_p1  ;;  %p1376_p8 = por %p1375_p6, %p1374_p2 }
  0x68   : > { %p1377_p10 = pnand %p1376_p8, %p1370_p5 }
  0x6a   : > { %1380 = shalt.err (!%p1377_p10)
}
  0x6b   : > { %s1462_s8 = smov 16   ;;  %s1463_s15 = smov 1  }
  0x6c   : > { %1226 = dma.hbm_to_vmem [thread:$0]  (!%p1604_p11), %s1647_s10, 128, %s1649_s12, %s1653_s2, %s1462_s8, %s1462_s8, %s1463_s15  }
  0x6d   : > { %p1962_p0 = scmp.ne.s32.totalorder %s1953_s26, 0 }
  0x6e   : > { %s1682_s6 = sand.u32 (!%p1962_p0), 1, %s1447_s19   ;;  %p1963_p4 = scmp.ne.s32.totalorder (!%p1962_p0), %s1951_s24, 0 }
  0x6f   : > { %249 = sbr.rel (%p1962_p0) target bundleno = 1175 (0x497), region = 36  ;;  %s1134_s11 = sshll.u32 (!%p1962_p0), %s1682_s6, 6 }
  0x70   : > { %s252_s16 = scalar_lea.sflag (!%p1962_p0), [#allocation3], %s1682_s6  ;;  %s1686_s17 = scalar_lea.vmem (!%p1962_p0), [#allocation2], %s1134_s11 }
  0x76   : > { %1426 = dma.done.wait (%p1963_p4), %s252_s16, 1024  }
  0x77   : > { %1428 = vsyncadd (%p1963_p4), %s252_s16, 4294966272  ;;  %s260_s2 = sand.u32 1, %s1517_s22   ;;  %s1135_s26 = sshll.u32 %s1682_s6, 3 }
  0x78   : > { %s261_s14 = scalar_lea.sflag [#allocation6], %s260_s2  ;;  %s1696_s10 = scalar_lea.vmem [#allocation5], %s1135_s26 }
  0x79   : > { %1430 = dma.done.wait (%p1963_p4), %s261_s14, 128  }
  0x7a   : > { %1432 = vsyncadd (%p1963_p4), %s261_s14, 4294967168  ;;  %p1964_p11 = scmp.eq.s32.totalorder %s1517_s22, 0 }
  0x7c   : > { %1434 = dma.done.wait (%p1964_p11), [#allocation6], 512   ;;  %p1965_p13 = pmov %p1964_p11 }
  0x7d   : > { %vm322_vm0 = vcmask 261120   ;;  %v318_v0 = vld [vmem:[#allocation7] sm:$0xff]  ;;  %v319_v1 = vld [vmem:[#allocation7 + $0x8] sm:$0xff]  ;;  %v320_v2 = vld [vmem:[#allocation7 + $0x10] sm:$0xff]  ;;  %v571_v63 = vlaneseq  ;;  %vm605_vm1 = vcmask 1041409   ;;  %vm607_vm2 = vcmask 1042434  }
  0x7e   : > { %1436 = vsyncadd (%p1965_p13), [#allocation6], 4294966784  ;;  %v1194_v3 = vpack.c.bf16 %v319_v1, %v318_v0  ;;  %v321_v4 = vld [vmem:[#allocation7 + $0x18] sm:$0xff]  ;;  %v1707_v5 = vld [vmem:[%s1686_s17] sm:$0xff]  ;;  %vm609_vm3 = vcmask 1043459   ;;  %vm611_vm4 = vcmask 1044484  }
  0x7f   : > { %v1198_v6 = vpack.c.bf16 %v321_v4, %v320_v2  ;;  %1182 = vmatprep.mubr.msk.f32.mxu0 %vm322_vm0, %v1707_v5  ;;  %v1712_v7 = vld [vmem:[%s1686_s17 + $0x20] sm:$0xff]  ;;  %v1717_v8 = vld [vmem:[%s1686_s17 + $0x8] sm:$0xff]  ;;  %v1723_v10 = vld [vmem:[%s1686_s17 + $0x10] sm:$0xff]  ;;  %v572_v0 = vand.u32 127, %v571_v63  ;;  %v1765_v1 = vshrl.u32 %v571_v63, 7  ;;  %vm613_vm5 = vcmask 1045509  }
  0x80   : > { %1195 = vmatprep.subr.bf16.mxu0 %v1194_v3  ;;  %1202 = vmatprep.subr.bf16.mxu1 %v1194_v3  ;;  %v1720_v9 = vld [vmem:[%s1686_s17 + $0x28] sm:$0xff]  ;;  %v1726_v11 = vld [vmem:[%s1686_s17 + $0x30] sm:$0xff]  ;;  %v1735_v12 = vld [vmem:[%s1686_s17 + $0x18] sm:$0xff]  ;;  %vm615_vm6 = vcmask 1046534   ;;  %vm617_vm7 = vcmask 1047559   ;;  %vm620_vm8 = vcmask 64512  }
  0x81   : > { %1197 = vmatpush3.bf16.msra.mxu0 %v1194_v3  ;;  %1204 = vmatpush3.bf16.msra.mxu1 %v1194_v3  ;;  %v1740_v13 = vld [vmem:[%s1686_s17 + $0x38] sm:$0xff]  ;;  %v1148_v14 = vld [vmem:[%s1696_s10 + $0x1] ss:$0 sm:$0xff]  ;;  %v1147_v15 = vld [vmem:[%s1696_s10] ss:$0 sm:$0xff]  ;;  %v1768_v3 = vsub.s32 %v572_v0, %v1765_v1  ;;  %p306_p3 = scmp.lt.s32.totalorder %s1517_s22, 1 }
  0x82   : > { %1199 = vmatprep.subr.bf16.mxu0 %v1198_v6  ;;  %1203 = vmatprep.subr.bf16.mxu1 %v1198_v6  ;;  %v1151_v16 = vld [vmem:[%s1696_s10 + $0x4] ss:$0 sm:$0xff]  ;;  %v1150_v23 = vld [vmem:[%s1696_s10 + $0x3] ss:$0 sm:$0xff]  ;;  %v1149_v24 = vld [vmem:[%s1696_s10 + $0x2] ss:$0 sm:$0xff] }
  0x83   : > { %1188 = vmatprep.mubr.msk.f32.mxu1 %vm322_vm0, %v1712_v7  ;;  %v1155_v25 = vld [vmem:[%s1943_s3] ss:$0 sm:$0xff]  ;;  %v1152_v28 = vld [vmem:[%s1696_s10 + $0x5] ss:$0 sm:$0xff]  ;;  %v1153_v29 = vld [vmem:[%s1696_s10 + $0x6] ss:$0 sm:$0xff] }
  0x84   : > { %v1154_v45 = vld [vmem:[%s1696_s10 + $0x7] ss:$0 sm:$0xff]  ;;  %s1858_s29 = scalar_select %p306_p3, %s1517_s22, 1 }
  0x85   : > { %1201 = vmatpush3.bf16.msra.mxu0 %v1198_v6  ;;  %1205 = vmatpush3.bf16.msra.mxu1 %v1198_v6  ;;  %s1157_s27 = sshll.u32 %s1517_s22, 7  ;;  %s297_s28 = scalar_lea.vmem [#allocation8], %s1135_s26 }
  0x86   : > { %s1138_s7 = sshll.u32 %s1858_s29, 3  ;;  %s994_s8 = sshll.u32 %s297_s28, 4  ;;  %s1896_s8 = int_to_ptr.vmem [resolvable:$true] %s994_s8 }
  0x87   : > { %s309_s23 = scalar_lea.vmem %s1945_s5, %s1138_s7  ;;  %s1894_s16 = scalar_lea.hbm %s1944_s4, %s1157_s27 }
  0x88   : > { %1183 = vmatmul.mubr.msk.f32.vlgmr.msra.gmra.mrb[0].mxu0 %vm322_vm0, %v1717_v8  ;;  %1189 = vmatmul.mubr.msk.f32.vlgmr.msra.gmra.mrb[0].mxu1 %vm322_vm0, %v1720_v9  ;;  %s977_s22 = scalar_lea.sflag [#allocation4], %s1682_s6  ;;  %s1381_s17 = scalar_lea.vmem %s1896_s8, 128 }
  0x89   : > { %1185 = vmatprep.mubr.msk.f32.mxu0 %vm322_vm0, %v1723_v10  ;;  %1191 = vmatprep.mubr.msk.f32.mxu1 %vm322_vm0, %v1726_v11  ;;  %p1382_p7 = scmp.ne.s32.totalorder %s1896_s8, %s1381_s17  ;;  %s1465_s2 = smov [#allocation8]  }
  0x8a   : > { %s1385_s26 = sshll.u32 %s1465_s2, 4  ;;  %s1386_s26 = int_to_ptr.vmem [resolvable:$false] %s1385_s26 }
  0x8b   : > { %p1383_p9 = pnand %p1382_p7, %p1590_p12  ;;  %s1387_s14 = scalar_lea.vmem %s1386_s26, 256 }
  0x8c   : > { %1186 = vmatmul.mubr.msk.f32.gmra.mrb[2].mxu0 %vm322_vm0, %v1735_v12  ;;  %1192 = vmatmul.mubr.msk.f32.gmra.mrb[2].mxu1 %vm322_vm0, %v1740_v13  ;;  %p1388_p5 = scmp.lt.s32.totalorder %s1896_s8, %s1386_s26  ;;  %p1389_p2 = scmp.lt.s32.totalorder %s1387_s14, %s1381_s17 }
  0x8d   : > { %p1384_p1 = pneg %p1383_p9 }
  0x8e   : > { %p1390_p6 = por %p1389_p2, %p1388_p5 }
  0x90   : > { %p1391_p8 = pnand %p1390_p6, %p1384_p1 }
 0x15b   : > { %v1184_v17 = vpop.f32.mrb[0].mxu0  ;;  %v1190_v18 = vpop.f32.mrb[0].mxu1 }
 0x15c   : > { %v509_v19 = vadd.f32 %v1184_v17, %v1148_v14  ;;  %v413_v20 = vpop.f32.mrb[1].mxu0  ;;  %v433_v21 = vpop.f32.mrb[1].mxu1  ;;  %v513_v39 = vadd.f32 %v1190_v18, %v1152_v28 }
 0x15d   : > { %v508_v22 = vadd.f32 %v1147_v15, %v413_v20  ;;  %v512_v26 = vadd.f32 %v1151_v16, %v433_v21 }
 0x15e   : > { %v517_v27 = vmax.f32 %v509_v19, 0.0  ;;  %v521_v49 = vmax.f32 %v513_v39, 0.0  ;;  %v639_v39 = vsub.s32 3, %v1765_v1 }
 0x15f   : > { %v516_v30 = vmax.f32 %v508_v22, 0.0  ;;  %v1187_v31 = vpop.f32.mrb[2].mxu0  ;;  %v1193_v32 = vpop.f32.mrb[2].mxu1  ;;  %v520_v36 = vmax.f32 %v512_v26, 0.0 }
 0x160   : > { %v511_v33 = vadd.f32 %v1187_v31, %v1150_v23  ;;  %v423_v34 = vpop.f32.mrb[3].mxu0  ;;  %v532_v35 = vmul.f32 %v1155_v25, %v517_v27  ;;  %v443_v37 = vpop.f32.mrb[3].mxu1  ;;  %v515_v50 = vadd.f32 %v1193_v32, %v1154_v45  ;;  %v536_v58 = vmul.f32 %v1155_v25, %v521_v49 }
 0x161   : > { %v510_v38 = vadd.f32 %v1149_v24, %v423_v34  ;;  %v514_v40 = vadd.f32 %v1153_v29, %v443_v37  ;;  %v531_v43 = vmul.f32 %v1155_v25, %v516_v30  ;;  %v535_v48 = vmul.f32 %v1155_v25, %v520_v36 }
 0x162   : > { %v519_v41 = vmax.f32 %v511_v33, 0.0  ;;  %v542_v42 = vsel %vm322_vm0, %v532_v35, 0.0  ;;  %v523_v56 = vmax.f32 %v515_v50, 0.0  ;;  %v554_v60 = vsel %vm322_vm0, %v536_v58, 0.0 }
 0x163   : > { %v518_v44 = vmax.f32 %v510_v38, 0.0  ;;  %543 = vadd.xlane.f32.xlu0 %v542_v42  ;;  %v522_v47 = vmax.f32 %v514_v40, 0.0  ;;  %v539_v51 = vsel %vm322_vm0, %v531_v43, 0.0  ;;  %v551_v54 = vsel %vm322_vm0, %v535_v48, 0.0 }
 0x164   : > { %v534_v46 = vmul.f32 %v1155_v25, %v519_v41  ;;  %v538_v61 = vmul.f32 %v1155_v25, %v523_v56  ;;  %v1464_v35 = vmov 0   ;;  %v627_v36 = vsub.s32 0, %v1765_v1 }
 0x165   : > { %v533_v53 = vmul.f32 %v1155_v25, %v518_v44  ;;  %v537_v55 = vmul.f32 %v1155_v25, %v522_v47  ;;  %1274 = vset.pattern.permute.xlu0 %v1464_v35  ;;  %1273 = vset.pattern.permute.xlu1 %v1464_v35  ;;  %v631_v37 = vsub.s32 1, %v1765_v1  ;;  %v635_v38 = vsub.s32 2, %v1765_v1 }
 0x166   : > { %v548_v52 = vsel %vm322_vm0, %v534_v46, 0.0  ;;  %v560_v62 = vsel %vm322_vm0, %v538_v61, 0.0  ;;  %v643_v44 = vsub.s32 4, %v1765_v1 }
 0x167   : > { %540 = vadd.xlane.f32.xlu0 %v539_v51  ;;  %549 = vadd.xlane.f32.xlu1 %v548_v52  ;;  %v545_v57 = vsel %vm322_vm0, %v533_v53, 0.0  ;;  %v557_v59 = vsel %vm322_vm0, %v537_v55, 0.0  ;;  %v647_v51 = vsub.s32 5, %v1765_v1  ;;  %v651_v55 = vsub.s32 6, %v1765_v1 }
 0x16b   : > { %546 = vadd.xlane.f32.xlu1 %v545_v57  ;;  %552 = vadd.xlane.f32.xlu0 %v551_v54 }
 0x16f   : > { %555 = vadd.xlane.f32.xlu1 %v554_v60  ;;  %558 = vadd.xlane.f32.xlu0 %v557_v59  ;;  %v655_v59 = vsub.s32 7, %v1765_v1 }
 0x173   : > { %561 = vadd.xlane.f32.xlu1 %v560_v62 }
 0x1f0   : > { %v544_v2 = vpop.xlane.xlu0 %543 }
 0x1f1   : > { %v580_v15 = vrot.slane %v544_v2, %v1768_v3 }
 0x1f4   : > { %v541_v4 = vpop.xlane.xlu0 %540  ;;  %v550_v6 = vpop.xlane.xlu1 %549 }
 0x1f5   : > { %v576_v14 = vrot.slane %v541_v4, %v1768_v3  ;;  %v588_v21 = vrot.slane %v550_v6, %v1768_v3 }
 0x1f7   : > { %v606_v20 = vsel %vm605_vm1, %v580_v15, %v576_v14 }
 0x1f8   : > { %v547_v16 = vpop.xlane.xlu1 %546  ;;  %v553_v17 = vpop.xlane.xlu0 %552 }
 0x1f9   : > { %v584_v18 = vrot.slane %v547_v16, %v1768_v3  ;;  %v592_v19 = vrot.slane %v553_v17, %v1768_v3 }
 0x1fb   : > { %v608_v22 = vsel %vm607_vm2, %v584_v18, %v606_v20 }
 0x1fc   : > { %v610_v23 = vsel %vm609_vm3, %v588_v21, %v608_v22  ;;  %v556_v24 = vpop.xlane.xlu1 %555  ;;  %v559_v25 = vpop.xlane.xlu0 %558 }
 0x1fd   : > { %v612_v26 = vsel %vm611_vm4, %v592_v19, %v610_v23  ;;  %v596_v27 = vrot.slane %v556_v24, %v1768_v3  ;;  %v600_v28 = vrot.slane %v559_v25, %v1768_v3 }
 0x1ff   : > { %v614_v29 = vsel %vm613_vm5, %v596_v27, %v612_v26 }
 0x200   : > { %v562_v30 = vpop.xlane.xlu1 %561  ;;  %v616_v32 = vsel %vm615_vm6, %v600_v28, %v614_v29 }
 0x201   : > { %v604_v31 = vrot.slane %v562_v30, %v1768_v3 }
 0x203   : > { %v618_v33 = vsel %vm617_vm7, %v604_v31, %v616_v32 }
 0x204   : > { %v621_v34 = vsel %vm620_vm8, %v618_v33, -inf }
 0x205   : > { %622 = vmax.xlane.f32.xlu0 %v621_v34 }
 0x292   : > { %v623_v40 = vpop.xlane.xlu0 %622 }
 0x293   : > { %v628_v41 = vrot.slane %v623_v40, %v627_v36  ;;  %v632_v42 = vrot.slane %v623_v40, %v631_v37  ;;  %v636_v43 = vrot.slane %v623_v40, %v635_v38  ;;  %v640_v45 = vrot.slane %v623_v40, %v639_v39 }
 0x294   : > { %v644_v52 = vrot.slane %v623_v40, %v643_v44  ;;  %v648_v56 = vrot.slane %v623_v40, %v647_v51  ;;  %v652_v60 = vrot.slane %v623_v40, %v651_v55 }
 0x295   : > { %v665_v46 = vsub.f32 %v541_v4, %v628_v41  ;;  %v666_v47 = vsub.f32 %v544_v2, %v632_v42  ;;  %v667_v48 = vsub.f32 %v547_v16, %v636_v43  ;;  %v668_v53 = vsub.f32 %v550_v6, %v640_v45 }
 0x296   : > { %v669_v57 = vsub.f32 %v553_v17, %v644_v52  ;;  %v670_v61 = vsub.f32 %v556_v24, %v648_v56  ;;  %v656_v2 = vrot.slane %v623_v40, %v655_v59  ;;  %v671_v4 = vsub.f32 %v559_v25, %v652_v60 }
 0x297   : > { %v673_v49 = vmul.f32 1.442695, %v665_v46  ;;  %v675_v50 = vmul.f32 1.442695, %v666_v47  ;;  %v677_v54 = vmul.f32 1.442695, %v667_v48 }
 0x298   : > { %v679_v58 = vmul.f32 1.442695, %v668_v53  ;;  %v681_v62 = vmul.f32 1.442695, %v669_v57  ;;  %v683_v6 = vmul.f32 1.442695, %v670_v61  ;;  %v672_v15 = vsub.f32 %v562_v30, %v656_v2 }
 0x299   : > { %1275 = vpow2.f32 %v673_v49  ;;  %v685_v16 = vmul.f32 1.442695, %v671_v4 }
 0x29a   : > { %1277 = vpow2.f32 %v675_v50  ;;  %v687_v18 = vmul.f32 1.442695, %v672_v15 }
 0x29b   : > { %1279 = vpow2.f32 %v677_v54 }
 0x29c   : > { %1281 = vpow2.f32 %v679_v58 }
 0x29d   : > { %1283 = vpow2.f32 %v681_v62 }
 0x29e   : > { %1285 = vpow2.f32 %v683_v6 }
 0x29f   : > { %1287 = vpow2.f32 %v685_v16 }
 0x2a0   : > { %1289 = vpow2.f32 %v687_v18 }
 0x2a3   : > { %v1276_v63 = vpop.eup %1275 }
 0x2a4   : > { %v1278_v0 = vpop.eup %1277  ;;  %698 = vperm.xlu1 %1273, %v1276_v63  }
 0x2a5   : > { %701 = vperm.xlu0 %1274, %v1278_v0   ;;  %v1280_v14 = vpop.eup %1279 }
 0x2a6   : > { %v1282_v17 = vpop.eup %1281 }
 0x2a7   : > { %v1284_v19 = vpop.eup %1283 }
 0x2a8   : > { %704 = vperm.xlu1 %1273, %v1280_v14   ;;  %v1286_v20 = vpop.eup %1285 }
 0x2a9   : > { %v1288_v21 = vpop.eup %1287 }
 0x2aa   : > { %v1290_v22 = vpop.eup %1289 }
 0x2ac   : > { %707 = vperm.xlu1 %1273, %v1282_v17  }
 0x2b0   : > { %710 = vperm.xlu1 %1273, %v1284_v19  }
 0x2b4   : > { %713 = vperm.xlu1 %1273, %v1286_v20  }
 0x2b8   : > { %716 = vperm.xlu1 %1273, %v1288_v21  }
 0x2bc   : > { %719 = vperm.xlu1 %1273, %v1290_v22  }
 0x323   : > { %v699_v23 = vpop.permute.xlu1 %698 }
 0x324   : > { %v702_v27 = vpop.permute.xlu0 %701  ;;  %v724_v30 = vrot.slane %v699_v23, %v1768_v3 }
 0x325   : > { %v728_v29 = vrot.slane %v702_v27, %v1768_v3 }
 0x327   : > { %v705_v24 = vpop.permute.xlu1 %704  ;;  %v753_v35 = vsel %vm605_vm1, %v728_v29, %v724_v30 }
 0x328   : > { %v732_v31 = vrot.slane %v705_v24, %v1768_v3 }
 0x32a   : > { %v754_v41 = vsel %vm607_vm2, %v732_v31, %v753_v35 }
 0x32b   : > { %v708_v25 = vpop.permute.xlu1 %707 }
 0x32c   : > { %v736_v32 = vrot.slane %v708_v25, %v1768_v3 }
 0x32e   : > { %v755_v43 = vsel %vm609_vm3, %v736_v32, %v754_v41 }
 0x32f   : > { %v711_v26 = vpop.permute.xlu1 %710 }
 0x330   : > { %v740_v33 = vrot.slane %v711_v26, %v1768_v3 }
 0x332   : > { %v756_v45 = vsel %vm611_vm4, %v740_v33, %v755_v43 }
 0x333   : > { %v714_v28 = vpop.permute.xlu1 %713 }
 0x334   : > { %v744_v40 = vrot.slane %v714_v28, %v1768_v3 }
 0x336   : > { %v757_v47 = vsel %vm613_vm5, %v744_v40, %v756_v45 }
 0x337   : > { %v717_v34 = vpop.permute.xlu1 %716 }
 0x338   : > { %v748_v42 = vrot.slane %v717_v34, %v1768_v3 }
 0x33a   : > { %v758_v49 = vsel %vm615_vm6, %v748_v42, %v757_v47 }
 0x33b   : > { %v720_v46 = vpop.permute.xlu1 %719 }
 0x33c   : > { %v752_v48 = vrot.slane %v720_v46, %v1768_v3 }
 0x33e   : > { %v759_v50 = vsel %vm617_vm7, %v752_v48, %v758_v49 }
 0x33f   : > { %v761_v52 = vsel %vm620_vm8, %v759_v50, 0.0 }
 0x340   : > { %762 = vadd.xlane.f32.xlu1 %v761_v52 }
 0x3cd   : > { %v763_v53 = vpop.xlane.xlu1 %762 }
 0x3ce   : > { %1291 = vrcp.f32 %v763_v53 }
 0x3d8   : > { %v1292_v54 = vpop.eup %1291 }
 0x3d9   : > { %v769_v56 = vrot.slane %v1292_v54, %v627_v36  ;;  %v773_v58 = vrot.slane %v1292_v54, %v631_v37  ;;  %v777_v61 = vrot.slane %v1292_v54, %v635_v38  ;;  %v781_v2 = vrot.slane %v1292_v54, %v639_v39 }
 0x3da   : > { %v785_v6 = vrot.slane %v1292_v54, %v643_v44  ;;  %v789_v37 = vrot.slane %v1292_v54, %v647_v51  ;;  %v793_v38 = vrot.slane %v1292_v54, %v651_v55  ;;  %v797_v39 = vrot.slane %v1292_v54, %v655_v59 }
 0x3db   : > { %v806_v57 = vmul.f32 %v1276_v63, %v769_v56  ;;  %v807_v60 = vmul.f32 %v1278_v0, %v773_v58  ;;  %v808_v62 = vmul.f32 %v1280_v14, %v777_v61  ;;  %v809_v4 = vmul.f32 %v1282_v17, %v781_v2 }
 0x3dc   : > { %v810_v36 = vmul.f32 %v1284_v19, %v785_v6  ;;  %v811_v63 = vmul.f32 %v1286_v20, %v789_v37  ;;  %v812_v0 = vmul.f32 %v1288_v21, %v793_v38  ;;  %v813_v14 = vmul.f32 %v1290_v22, %v797_v39 }
 0x3dd   : > { %823 = vperm.xlu0 %1274, %v806_v57  }
 0x3e1   : > { %826 = vperm.xlu0 %1274, %v807_v60  }
 0x3e5   : > { %829 = vperm.xlu0 %1274, %v808_v62  }
 0x3e9   : > { %832 = vperm.xlu0 %1274, %v809_v4  }
 0x3ed   : > { %835 = vperm.xlu0 %1274, %v810_v36  }
 0x3f1   : > { %838 = vperm.xlu0 %1274, %v811_v63  }
 0x3f5   : > { %841 = vperm.xlu0 %1274, %v812_v0  }
 0x3f9   : > { %844 = vperm.xlu0 %1274, %v813_v14  }
 0x45c   : > { %v824_v15 = vpop.permute.xlu0 %823 }
 0x45d   : > { %v895_v17 = vmul.f32 %v824_v15, %v1707_v5  ;;  %v849_v33 = vrot.slane %v824_v15, %v1768_v3 }
 0x45f   : > { %v903_v19 = vsel %vm322_vm0, %v895_v17, 0.0 }
 0x460   : > { %v827_v44 = vpop.permute.xlu0 %826  ;;  %v904_v22 = vrot.slane %v903_v19, 4 }
 0x461   : > { %v896_v16 = vmul.f32 %v827_v44, %v1717_v8 }
 0x462   : > { %v905_v26 = vadd.f32 %v904_v22, %v903_v19 }
 0x463   : > { %v910_v55 = vsel %vm322_vm0, %v896_v16, 0.0 }
 0x464   : > { %v830_v51 = vpop.permute.xlu0 %829  ;;  %v911_v21 = vrot.slane %v910_v55, 4 }
 0x465   : > { %v897_v18 = vmul.f32 %v830_v51, %v1723_v10  ;;  %v857_v35 = vrot.slane %v830_v51, %v1768_v3 }
 0x466   : > { %v912_v10 = vadd.f32 %v911_v21, %v910_v55 }
 0x467   : > { %v917_v1 = vsel %vm322_vm0, %v897_v18, 0.0 }
 0x468   : > { %v833_v59 = vpop.permute.xlu0 %832  ;;  %v918_v23 = vrot.slane %v917_v1, 4  ;;  %v913_v34 = vrot.slane %v912_v10, 2 }
 0x469   : > { %v898_v20 = vmul.f32 %v833_v59, %v1735_v12  ;;  %v853_v12 = vrot.slane %v827_v44, %v1768_v3  ;;  %v861_v42 = vrot.slane %v833_v59, %v1768_v3 }
 0x46a   : > { %v919_v27 = vadd.f32 %v918_v23, %v917_v1  ;;  %v914_v53 = vadd.f32 %v913_v34, %v912_v10 }
 0x46b   : > { %v924_v8 = vsel %vm322_vm0, %v898_v20, 0.0  ;;  %v878_v48 = vsel %vm605_vm1, %v853_v12, %v849_v33 }
 0x46c   : > { %v925_v24 = vrot.slane %v924_v8, 4  ;;  %v836_v5 = vpop.permute.xlu0 %835  ;;  %v920_v41 = vrot.slane %v919_v27, 2  ;;  %v879_v54 = vsel %vm607_vm2, %v857_v35, %v878_v48  ;;  %v915_v39 = vrot.slane %v914_v53, 1 }
 0x46d   : > { %v899_v25 = vmul.f32 %v836_v5, %v1712_v7  ;;  %v906_v7 = vrot.slane %v905_v26, 2  ;;  %v865_v46 = vrot.slane %v836_v5, %v1768_v3  ;;  %v880_v61 = vsel %vm609_vm3, %v861_v42, %v879_v54 }
 0x46e   : > { %v926_v29 = vadd.f32 %v925_v24, %v924_v8  ;;  %v921_v60 = vadd.f32 %v920_v41, %v919_v27 }
 0x46f   : > { %v931_v28 = vsel %vm322_vm0, %v899_v25, 0.0  ;;  %v907_v58 = vadd.f32 %v906_v7, %v905_v26  ;;  %v881_v4 = vsel %vm611_vm4, %v865_v46, %v880_v61 }
 0x470   : > { %v932_v30 = vrot.slane %v931_v28, 4  ;;  %v839_v31 = vpop.permute.xlu0 %838  ;;  %v927_v45 = vrot.slane %v926_v29, 2  ;;  %v922_v16 = vrot.slane %v921_v60, 1 }
 0x471   : > { %v900_v32 = vmul.f32 %v839_v31, %v1720_v9  ;;  %v869_v50 = vrot.slane %v839_v31, %v1768_v3  ;;  %v908_v18 = vrot.slane %v907_v58, 1 }
 0x472   : > { %v933_v40 = vadd.f32 %v932_v30, %v931_v28  ;;  %v928_v2 = vadd.f32 %v927_v45, %v926_v29  ;;  %v923_v22 = vadd.f32 %v922_v16, %v921_v60 }
 0x473   : > { %v938_v43 = vsel %vm322_vm0, %v900_v32, 0.0  ;;  %v882_v63 = vsel %vm613_vm5, %v869_v50, %v881_v4  ;;  %v909_v23 = vadd.f32 %v908_v18, %v907_v58 }
 0x474   : > { %v939_v47 = vrot.slane %v938_v43, 4  ;;  %v842_v9 = vpop.permute.xlu0 %841  ;;  %v934_v49 = vrot.slane %v933_v40, 2  ;;  %v929_v55 = vrot.slane %v928_v2, 1 }
 0x475   : > { %v901_v52 = vmul.f32 %v842_v9, %v1726_v11  ;;  %v873_v57 = vrot.slane %v842_v9, %v1768_v3 }
 0x476   : > { %v940_v56 = vadd.f32 %v939_v47, %v938_v43  ;;  %v935_v11 = vadd.f32 %v934_v49, %v933_v40  ;;  %v930_v8 = vadd.f32 %v929_v55, %v928_v2 }
 0x477   : > { %v945_v62 = vsel %vm322_vm0, %v901_v52, 0.0  ;;  %v883_v15 = vsel %vm615_vm6, %v873_v57, %v882_v63 }
 0x478   : > { %v941_v6 = vrot.slane %v940_v56, 2  ;;  %v946_v36 = vrot.slane %v945_v62, 4  ;;  %v845_v37 = vpop.permute.xlu0 %844  ;;  %v936_v59 = vrot.slane %v935_v11, 1 }
 0x479   : > { %v877_v38 = vrot.slane %v845_v37, %v1768_v3  ;;  %v902_v0 = vmul.f32 %v845_v37, %v1740_v13  ;;  %v916_v3 = vadd.f32 %v915_v39, %v914_v53 }
 0x47a   : > { %v942_v14 = vadd.f32 %v941_v6, %v940_v56  ;;  %v947_v44 = vadd.f32 %v946_v36, %v945_v62  ;;  %v937_v25 = vadd.f32 %v936_v59, %v935_v11 }
 0x47b   : > { %v884_v17 = vsel %vm617_vm7, %v877_v38, %v883_v15  ;;  %v952_v51 = vsel %vm322_vm0, %v902_v0, 0.0  ;;  %v967_v10 = vsel %vm605_vm1, %v916_v3, %v909_v23 }
 0x47c   : > { %v948_v19 = vrot.slane %v947_v44, 2  ;;  %886 = vst.msk [vmem:[%s309_s23] sm:$0xff] %vm620_vm8, %v884_v17  ;;  %v953_v1 = vrot.slane %v952_v51, 4  ;;  %v943_v20 = vrot.slane %v942_v14, 1  ;;  %v968_v28 = vsel %vm607_vm2, %v923_v22, %v967_v10 }
 0x47d   : > { %v969_v30 = vsel %vm609_vm3, %v930_v8, %v968_v28 }
 0x47e   : > { %v949_v13 = vadd.f32 %v948_v19, %v947_v44  ;;  %v954_v21 = vadd.f32 %v953_v1, %v952_v51  ;;  %v944_v26 = vadd.f32 %v943_v20, %v942_v14  ;;  %v970_v12 = vsel %vm611_vm4, %v937_v25, %v969_v30 }
 0x480   : > { %v950_v24 = vrot.slane %v949_v13, 1  ;;  %v955_v5 = vrot.slane %v954_v21, 2  ;;  %v971_v32 = vsel %vm613_vm5, %v944_v26, %v970_v12 }
 0x482   : > { %v956_v27 = vadd.f32 %v955_v5, %v954_v21  ;;  %v951_v29 = vadd.f32 %v950_v24, %v949_v13 }
 0x484   : > { %v957_v31 = vrot.slane %v956_v27, 1  ;;  %v972_v34 = vsel %vm615_vm6, %v951_v29, %v971_v32 }
 0x486   : > { %v958_v33 = vadd.f32 %v957_v31, %v956_v27 }
 0x488   : > { %v973_v35 = vsel %vm617_vm7, %v958_v33, %v972_v34 }
 0x489   : > { %975 = vst.msk [vmem:[%s297_s28] sm:$0xff] %vm322_vm0, %v973_v35 }
 0x48a   : > { %1394 = shalt.err (!%p1391_p8)
}
 0x48b   : > { %s1395_s6 = scalar_lea.hbm %s1894_s16, 128  ;;  %s1399_s12 = scalar_lea.hbm %s1944_s4, 256 }
 0x48c   : > { %p1396_p10 = scmp.ne.s32.totalorder %s1894_s16, %s1395_s6  ;;  %p1400_p11 = scmp.lt.u32.totalorder %s1894_s16, %s1944_s4 }
 0x48d   : > { %p1401_p13 = scmp.lt.u32.totalorder %s1399_s12, %s1395_s6  ;;  %p1403_p7 = scmp.lt.u32.totalorder %s1395_s6, %s1894_s16 }
 0x48e   : > { %p1397_p0 = pnand %p1396_p10, %p1590_p12 }
 0x48f   : > { %p1402_p3 = por %p1401_p13, %p1400_p11 }
 0x490   : > { %p1398_p4 = pneg %p1397_p0 }
 0x491   : > { %p1404_p9 = por %p1403_p7, %p1402_p3 }
 0x493   : > { %p1405_p1 = pnand %p1404_p9, %p1398_p4 }
 0x495   : > { %1408 = shalt.err (!%p1405_p1)
}
 0x496   : > { %1214 = dma.vmem_to_hbm [thread:$0]  (%p1590_p12), %s1896_s8, 128, %s1894_s16, %s977_s22  }
 0x497 PF: > { %s1009_s13 = sand.u32 1, %s1443_s18   ;;  %p1966_p5 = scmp.ne.s32.totalorder %s1952_s25, 0 }
 0x498   : > { %p1967_p2 = scmp.ge.s32.totalorder %s1455_s21, 2  ;;  %s1010_s0 = scalar_lea.sflag [#allocation4], %s1009_s13 }
 0x49a   : > { %p1228_p6 = pnand %p1967_p2, %p1966_p5 }
 0x49c   : > { %1438 = dma.done.wait (!%p1228_p6), %s1010_s0, 128  }
 0x49d   : > { %1440 = vsyncadd (!%p1228_p6), %s1010_s0, 4294967168  ;;  %s1968_s23 = sld [smem:[#allocation13_spill]]  ;;  %p22_p8 = scmp.ge.s32.totalorder %s1552_s30, 4  }
 0x49e   : > { %s1969_s18 = smov %s1447_s19  ;;  %s1970_s19 = smov %s1451_s20 }
 0x49f   : > { %s1972_s21 = smov %s1552_s30  ;;  %24 = sbr.rel (!%p22_p8) target bundleno = 10 (0xa), region = 110 }
 0x4a3   : > { %s1971_s20 = smov %s1968_s23 }
 0x4a6   :  { %1022 = vsyncpa [#allocation3], 1 }
 0x4a7   :  { %1024 = vsyncpa [#allocation3 + $0x1], 1 }
 0x4a8   :  { %1025 = vsyncpa [#allocation6], 1 }
 0x4a9   :  { %1027 = vsyncpa [#allocation6 + $0x1], 1 }
 0x4aa   :  { %1028 = vsyncpa [#allocation4], 1 }
 0x4ab   :  { %1030 = vsyncpa [#allocation4 + $0x1], 1 }

</bundles_post_ra>
